<compile_context>
chip_gen: v5e
topology: v5e:2x2
jax: 0.10.0
libtpu: 0.0.40
codegen_flags: <defaults>
</compile_context>

<pallas_src>
import functools

import jax
import jax.numpy as jnp
import numpy as np
from jax.experimental import pallas as pl
from jax.experimental.pallas import tpu as pltpu

_SUBLANE = 8
_LANE = 128
_MAX_TILE_N = 1024
_VMEM_BUDGET_BYTES = 44 * 1024 * 1024   # tiling budget (safe on v7x's 64 MiB/TC)
_VMEM_LIMIT_BYTES = 56 * 1024 * 1024    # lifts v5e/v6e scoped defaults, < v7x physical


def _round_up(x, m):
    return (x + m - 1) // m * m


def _choose_tile_n(n, f_pad, weight_vmem_bytes):
    """Node-tile size from a VMEM budget (review: derive, don't hardcode 256)."""
    n8 = _round_up(max(n, 1), _SUBLANE)
    # Per node row (f32 words): double-buffered node I/O blocks
    #   in  s (F) + v (3F), out s (F) + v (3F)  -> 8F x 2 buffers = 16F
    # plus ~24F of live temps (uvvv, uv/vv, mlp_in, h, a, bf16 copies).
    per_row_bytes = 4 * (16 + 24) * f_pad
    tn = (_VMEM_BUDGET_BYTES - weight_vmem_bytes) // per_row_bytes
    tn = int(max(_SUBLANE, min(tn, _MAX_TILE_N, n8)))
    tn = tn // _SUBLANE * _SUBLANE
    # Keep at least 2 grid blocks when possible so the "parallel" node axis feeds
    # both TensorCores on v7x (on 1-TC chips it is just one extra cheap step).
    if n8 > _SUBLANE and -(-n8 // tn) < 2:
        tn = _round_up(-(-n8 // 2), _SUBLANE)
    return tn
    # TODO(synk): for very large F (f32 weights comparable to the VMEM budget)
    # the resident weights would need to be streamed over a K grid axis instead.


def painn_update_kernel(s_ref, v_ref, wuv_ref, w1_ref, b1_ref, w2_ref, b2_ref,
                        out_s_ref, out_v_ref, *, matmul_dtype):
    s = s_ref[...]                                   # (TN, F) f32
    v = v_ref[...]                                   # (3, TN, F) f32
    tn, f = s.shape

    def mm(lhs, rhs_ref):
        # MXU matmul with bf16 (or f32) operands and f32 accumulation.
        return jnp.dot(lhs.astype(matmul_dtype), rhs_ref[...],
                       preferred_element_type=jnp.float32)

    # Fused linearU | linearV: one (3*TN, F) x (F, 2F) push instead of two.
    # The reshape only merges the free leading axis (TN is a sublane multiple).
    v2d = v.reshape(3 * tn, f)
    uvvv = mm(v2d, wuv_ref).reshape(3, tn, 2 * f)
    uv = uvvv[:, :, :f]          # lane-aligned split (F is a multiple of 128)
    vv = uvvv[:, :, f:]

    # xyz reductions = three full-tile VPU mul/adds (leading-axis indexing is free).
    # TODO(synk): no stability eps in the norm (matches torch.linalg.norm forward);
    # add one if this kernel ever gets a custom VJP.
    vv_norm = jnp.sqrt(vv[0] * vv[0] + vv[1] * vv[1] + vv[2] * vv[2])    # (TN, F)
    inner_prod = uv[0] * vv[0] + uv[1] * vv[1] + uv[2] * vv[2]           # (TN, F)

    # Combined MLP, re-fused: (TN,2F)x(2F,F) + SiLU + (TN,F)x(F,3F).
    # The concat / output splits are lane-aligned because F % 128 == 0.
    mlp_in = jnp.concatenate([s, vv_norm], axis=1)                       # (TN, 2F)
    h = mm(mlp_in, w1_ref) + b1_ref[...]
    h = h * jax.nn.sigmoid(h)                                            # SiLU (EUP)
    a = mm(h, w2_ref) + b2_ref[...]                                      # (TN, 3F)
    a_ss, a_sv, a_vv = a[:, :f], a[:, f:2 * f], a[:, 2 * f:]

    out_s_ref[...] = (s + a_ss + a_sv * inner_prod).astype(out_s_ref.dtype)
    out_v_ref[...] = (v + a_vv[None, :, :] * uv).astype(out_v_ref.dtype)


def painn_update(node_state_scalar, node_state_vector, params, *,
                 matmul_dtype=jnp.bfloat16, vector_layout="n3f", tile_n=None):
    """PaiNN update.

    node_state_scalar: (N, F).
    node_state_vector: (N, 3, F) if vector_layout == "n3f" (module API), or
                       (3, N, F) if vector_layout == "3nf" (component-major;
                       skips the wrapper relayout passes entirely).
    """
    n, f = node_state_scalar.shape
    wu, wv, w1, b1, w2, b2 = params

    f_pad = _round_up(max(f, _LANE), _LANE)
    wdt = jnp.dtype(matmul_dtype)

    # ---- Wrapper-side weight prep (fold into jit / pre-compute once in practice).
    def pad2(x, shape):
        return jnp.pad(x, [(0, t - s) for s, t in zip(x.shape, shape)])

    # linearU | linearV fused into one (F, 2F) weight -> single MXU push per tile.
    wuv = jnp.concatenate([pad2(wu, (f_pad, f_pad)),
                           pad2(wv, (f_pad, f_pad))], axis=1).astype(wdt)

    # MLP layer 1: rows [0:F] act on s, rows [F_pad:F_pad+F] act on ||Vv||.
    w1p = jnp.zeros((2 * f_pad, f_pad), w1.dtype)
    w1p = w1p.at[:f, :f].set(w1[:f]).at[f_pad:f_pad + f, :f].set(w1[f:])
    w1p = w1p.astype(wdt)
    b1p = pad2(b1, (1, f_pad)).astype(jnp.float32)

    # MLP layer 2: ss / sv / vv column blocks re-based at lane-aligned offsets
    # 0, F_pad, 2*F_pad so the in-kernel split is a free aligned slice.
    w2p = jnp.zeros((f_pad, 3 * f_pad), w2.dtype)
    b2p = jnp.zeros((1, 3 * f_pad), b2.dtype)
    for blk in range(3):
        w2p = w2p.at[:f, blk * f_pad:blk * f_pad + f].set(w2[:, blk * f:(blk + 1) * f])
        b2p = b2p.at[:, blk * f_pad:blk * f_pad + f].set(b2[:, blk * f:(blk + 1) * f])
    w2p = w2p.astype(wdt)
    b2p = b2p.astype(jnp.float32)

    # ---- Vector-state layout.
    if vector_layout == "n3f":
        # One XLA relayout pass each way.  Callers that keep the vector state
        # component-major across the model should pass vector_layout="3nf" to
        # avoid this HBM traffic (review feedback).
        v3nf = jnp.transpose(node_state_vector, (1, 0, 2))
    elif vector_layout == "3nf":
        v3nf = node_state_vector
    else:
        raise ValueError(f"unknown vector_layout: {vector_layout!r}")

    # ---- Node tiling from a VMEM budget (resident weights are double-buffered).
    weight_vmem = 2 * (7 * f_pad * f_pad * wdt.itemsize + 4 * f_pad * 4)
    tn = tile_n if tile_n is not None else _choose_tile_n(n, f_pad, weight_vmem)
    tn = max(_SUBLANE, min(int(tn), _round_up(n, _SUBLANE)))
    tn = _round_up(tn, _SUBLANE)
    n_pad = _round_up(n, tn)

    s_in = jnp.pad(node_state_scalar, ((0, n_pad - n), (0, f_pad - f)))
    v_in = jnp.pad(v3nf, ((0, 0), (0, n_pad - n), (0, f_pad - f)))

    grid = (n_pad // tn,)
    node_spec = pl.BlockSpec((tn, f_pad), lambda i: (i, 0))
    vec_spec = pl.BlockSpec((3, tn, f_pad), lambda i: (0, i, 0))
    # Resident weights / biases (constant index_map).  If profiling shows exposed
    # DMA for small F, deepen node_spec/vec_spec with pipeline_mode=pl.Buffered(3).
    wuv_spec = pl.BlockSpec((f_pad, 2 * f_pad), lambda i: (0, 0))
    w1_spec = pl.BlockSpec((2 * f_pad, f_pad), lambda i: (0, 0))
    b1_spec = pl.BlockSpec((1, f_pad), lambda i: (0, 0))
    w2_spec = pl.BlockSpec((f_pad, 3 * f_pad), lambda i: (0, 0))
    b2_spec = pl.BlockSpec((1, 3 * f_pad), lambda i: (0, 0))

    cost = pl.CostEstimate(
        flops=2 * n_pad * f_pad * f_pad * 11,          # (3N,F)x(F,2F) + (N,2F)x(2F,F) + (N,F)x(F,3F)
        transcendentals=2 * n_pad * f_pad,             # sqrt + sigmoid
        bytes_accessed=(4 * 8 * n_pad * f_pad          # node I/O (f32)
                        + wdt.itemsize * 7 * f_pad * f_pad   # fused weights
                        + 4 * 4 * f_pad),                     # biases
    )

    kernel = functools.partial(painn_update_kernel, matmul_dtype=wdt)
    out_s, out_v = pl.pallas_call(
        kernel,
        grid=grid,
        in_specs=[node_spec, vec_spec, wuv_spec, w1_spec, b1_spec, w2_spec, b2_spec],
        out_specs=(node_spec, vec_spec),
        out_shape=(
            jax.ShapeDtypeStruct((n_pad, f_pad), node_state_scalar.dtype),
            jax.ShapeDtypeStruct((3, n_pad, f_pad), node_state_vector.dtype),
        ),
        compiler_params=pltpu.CompilerParams(
            dimension_semantics=("parallel",),
            vmem_limit_bytes=_VMEM_LIMIT_BYTES,
        ),
        cost_estimate=cost,
    )(s_in, v_in, wuv, w1p, b1p, w2p, b2p)

    out_s = out_s[:n, :f]
    out_v = out_v[:, :n, :f]
    if vector_layout == "n3f":
        out_v = jnp.transpose(out_v, (1, 0, 2))
    return out_s, out_v


def painn_update_ref(s, v, params):
    """Plain-JAX f32 reference mirroring the PyTorch forward."""
    wu, wv, w1, b1, w2, b2 = params
    f = s.shape[1]
    uv = jnp.einsum("ncf,fg->ncg", v, wu)
    vv = jnp.einsum("ncf,fg->ncg", v, wv)
    vv_norm = jnp.linalg.norm(vv, axis=1)
    mlp_in = jnp.concatenate([s, vv_norm], axis=1)
    h = mlp_in @ w1 + b1
    h = h * jax.nn.sigmoid(h)
    mlp_out = h @ w2 + b2
    a_ss, a_sv, a_vv = mlp_out[:, :f], mlp_out[:, f:2 * f], mlp_out[:, 2 * f:]
    inner_prod = jnp.sum(uv * vv, axis=1)
    delta_v = a_vv[:, None, :] * uv
    delta_s = a_ss + a_sv * inner_prod
    return s + delta_s, v + delta_v


def init_params(key, node_size):
    """Deterministic synthetic parameters (variational linears -> plain linears)."""
    ks = jax.random.split(key, 6)
    scale = 1.0 / np.sqrt(node_size)
    wu = jax.random.normal(ks[0], (node_size, node_size), jnp.float32) * scale      # linearU (no bias)
    wv = jax.random.normal(ks[1], (node_size, node_size), jnp.float32) * scale      # linearV (no bias)
    w1 = jax.random.normal(ks[2], (2 * node_size, node_size), jnp.float32) * scale  # MLP layer 1
    b1 = jax.random.normal(ks[3], (1, node_size), jnp.float32) * 0.1
    w2 = jax.random.normal(ks[4], (node_size, 3 * node_size), jnp.float32) * scale  # MLP layer 2
    b2 = jax.random.normal(ks[5], (1, 3 * node_size), jnp.float32) * 0.1
    return wu, wv, w1, b1, w2, b2


if __name__ == "__main__":
    num_nodes = 8
    node_size = 32

    key = jax.random.PRNGKey(0)
    k_s, k_v, k_p = jax.random.split(key, 3)
    node_state_scalar = jax.random.normal(k_s, (num_nodes, node_size), jnp.float32)
    node_state_vector = jax.random.normal(k_v, (num_nodes, 3, node_size), jnp.float32)
    params = init_params(k_p, node_size)

    ref_s, ref_v = painn_update_ref(node_state_scalar, node_state_vector, params)

    # 1) f32-MXU path: exact check against the plain-JAX reference.
    out_s, out_v = painn_update(node_state_scalar, node_state_vector, params,
                                matmul_dtype=jnp.float32)
    jax.block_until_ready((out_s, out_v))
    np.testing.assert_allclose(np.asarray(out_s), np.asarray(ref_s), rtol=1e-5, atol=1e-5)
    np.testing.assert_allclose(np.asarray(out_v), np.asarray(ref_v), rtol=1e-5, atol=1e-5)

    # 2) transpose-free component-major layout (vector state kept as (3, N, F)).
    v_3nf = jnp.transpose(node_state_vector, (1, 0, 2))
    out_s2, out_v2 = painn_update(node_state_scalar, v_3nf, params,
                                  matmul_dtype=jnp.float32, vector_layout="3nf")
    jax.block_until_ready((out_s2, out_v2))
    np.testing.assert_allclose(np.asarray(out_s2), np.asarray(ref_s), rtol=1e-5, atol=1e-5)
    np.testing.assert_allclose(np.asarray(out_v2),
                               np.asarray(jnp.transpose(ref_v, (1, 0, 2))),
                               rtol=1e-5, atol=1e-5)

    # 3) default bf16-MXU path (f32 accumulation): mixed-precision smoke check
    #    against the f32 reference (loosened tolerance per the perf review).
    out_s3, out_v3 = painn_update(node_state_scalar, node_state_vector, params)
    jax.block_until_ready((out_s3, out_v3))
    np.testing.assert_allclose(np.asarray(out_s3), np.asarray(ref_s), rtol=1e-1, atol=2e-1)
    np.testing.assert_allclose(np.asarray(out_v3), np.asarray(ref_v), rtol=1e-1, atol=2e-1)

    print("KERNEL_OK")
</pallas_src>

<mosaic_0001>
module attributes {stable_mosaic.version = 11 : i64} {
  func.func @painn_update_kernel(%arg0: i32, %arg1: memref<8x128xf32, #tpu.memory_space<vmem>>, %arg2: memref<3x8x128xf32, #tpu.memory_space<vmem>>, %arg3: memref<128x256xf32, #tpu.memory_space<vmem>>, %arg4: memref<256x128xf32, #tpu.memory_space<vmem>>, %arg5: memref<1x128xf32, #tpu.memory_space<vmem>>, %arg6: memref<128x384xf32, #tpu.memory_space<vmem>>, %arg7: memref<1x384xf32, #tpu.memory_space<vmem>>, %arg8: memref<8x128xf32, #tpu.memory_space<vmem>>, %arg9: memref<3x8x128xf32, #tpu.memory_space<vmem>>) attributes {dimension_semantics = [#tpu.dimension_semantics<parallel>], iteration_bounds = array<i64: 1>, scalar_prefetch = 0 : i64, scratch_operands = 0 : i64, tpu.core_type = #tpu.core_type<tc>, window_params = [{transform_indices = @transform_0, window_bounds = array<i64: 8, 128>}, {transform_indices = @transform_1, window_bounds = array<i64: 3, 8, 128>}, {pipeline_mode = #tpu.pipeline_mode<synchronous>, transform_indices = @transform_2, window_bounds = array<i64: 128, 256>}, {pipeline_mode = #tpu.pipeline_mode<synchronous>, transform_indices = @transform_3, window_bounds = array<i64: 256, 128>}, {pipeline_mode = #tpu.pipeline_mode<synchronous>, transform_indices = @transform_4, window_bounds = array<i64: 1, 128>}, {pipeline_mode = #tpu.pipeline_mode<synchronous>, transform_indices = @transform_5, window_bounds = array<i64: 128, 384>}, {pipeline_mode = #tpu.pipeline_mode<synchronous>, transform_indices = @transform_6, window_bounds = array<i64: 1, 384>}, {transform_indices = @transform_7, window_bounds = array<i64: 8, 128>}, {transform_indices = @transform_8, window_bounds = array<i64: 3, 8, 128>}]} {
    %c0 = arith.constant 0 : index
    %c0_0 = arith.constant 0 : index
    %0 = vector.load %arg1[%c0, %c0_0] : memref<8x128xf32, #tpu.memory_space<vmem>>, vector<8x128xf32>
    %c0_1 = arith.constant 0 : index
    %c0_2 = arith.constant 0 : index
    %c0_3 = arith.constant 0 : index
    %1 = vector.load %arg2[%c0_1, %c0_2, %c0_3] : memref<3x8x128xf32, #tpu.memory_space<vmem>>, vector<3x8x128xf32>
    %2 = vector.shape_cast %1 : vector<3x8x128xf32> to vector<24x128xf32>
    %c0_4 = arith.constant 0 : index
    %c0_5 = arith.constant 0 : index
    %3 = vector.load %arg3[%c0_4, %c0_5] : memref<128x256xf32, #tpu.memory_space<vmem>>, vector<128x256xf32>
    %cst = arith.constant dense<0.000000e+00> : vector<24x256xf32>
    %4 = tpu.matmul %2, %3, %cst {dimension_numbers = #tpu.dot_dimension_numbers<[1], [0], [0], [1], [0, 0, 1, 1], [], []>} : vector<24x128xf32>, vector<128x256xf32>, vector<24x256xf32> -> vector<24x256xf32>
    %5 = vector.shape_cast %4 : vector<24x256xf32> to vector<3x8x256xf32>
    %6 = vector.extract_strided_slice %5 {offsets = [0, 0, 0], sizes = [3, 8, 128], strides = [1, 1, 1]} : vector<3x8x256xf32> to vector<3x8x128xf32>
    %7 = vector.extract_strided_slice %5 {offsets = [0, 0, 128], sizes = [3, 8, 128], strides = [1, 1, 1]} : vector<3x8x256xf32> to vector<3x8x128xf32>
    %8 = vector.extract_strided_slice %7 {offsets = [0, 0, 0], sizes = [1, 8, 128], strides = [1, 1, 1]} : vector<3x8x128xf32> to vector<1x8x128xf32>
    %9 = vector.shape_cast %8 : vector<1x8x128xf32> to vector<8x128xf32>
    %10 = vector.extract_strided_slice %7 {offsets = [0, 0, 0], sizes = [1, 8, 128], strides = [1, 1, 1]} : vector<3x8x128xf32> to vector<1x8x128xf32>
    %11 = vector.shape_cast %10 : vector<1x8x128xf32> to vector<8x128xf32>
    %12 = arith.mulf %9, %11 : vector<8x128xf32>
    %13 = vector.extract_strided_slice %7 {offsets = [1, 0, 0], sizes = [1, 8, 128], strides = [1, 1, 1]} : vector<3x8x128xf32> to vector<1x8x128xf32>
    %14 = vector.shape_cast %13 : vector<1x8x128xf32> to vector<8x128xf32>
    %15 = vector.extract_strided_slice %7 {offsets = [1, 0, 0], sizes = [1, 8, 128], strides = [1, 1, 1]} : vector<3x8x128xf32> to vector<1x8x128xf32>
    %16 = vector.shape_cast %15 : vector<1x8x128xf32> to vector<8x128xf32>
    %17 = arith.mulf %14, %16 : vector<8x128xf32>
    %18 = arith.addf %12, %17 : vector<8x128xf32>
    %19 = vector.extract_strided_slice %7 {offsets = [2, 0, 0], sizes = [1, 8, 128], strides = [1, 1, 1]} : vector<3x8x128xf32> to vector<1x8x128xf32>
    %20 = vector.shape_cast %19 : vector<1x8x128xf32> to vector<8x128xf32>
    %21 = vector.extract_strided_slice %7 {offsets = [2, 0, 0], sizes = [1, 8, 128], strides = [1, 1, 1]} : vector<3x8x128xf32> to vector<1x8x128xf32>
    %22 = vector.shape_cast %21 : vector<1x8x128xf32> to vector<8x128xf32>
    %23 = arith.mulf %20, %22 : vector<8x128xf32>
    %24 = arith.addf %18, %23 : vector<8x128xf32>
    %25 = math.sqrt %24 : vector<8x128xf32>
    %26 = vector.extract_strided_slice %6 {offsets = [0, 0, 0], sizes = [1, 8, 128], strides = [1, 1, 1]} : vector<3x8x128xf32> to vector<1x8x128xf32>
    %27 = vector.shape_cast %26 : vector<1x8x128xf32> to vector<8x128xf32>
    %28 = vector.extract_strided_slice %7 {offsets = [0, 0, 0], sizes = [1, 8, 128], strides = [1, 1, 1]} : vector<3x8x128xf32> to vector<1x8x128xf32>
    %29 = vector.shape_cast %28 : vector<1x8x128xf32> to vector<8x128xf32>
    %30 = arith.mulf %27, %29 : vector<8x128xf32>
    %31 = vector.extract_strided_slice %6 {offsets = [1, 0, 0], sizes = [1, 8, 128], strides = [1, 1, 1]} : vector<3x8x128xf32> to vector<1x8x128xf32>
    %32 = vector.shape_cast %31 : vector<1x8x128xf32> to vector<8x128xf32>
    %33 = vector.extract_strided_slice %7 {offsets = [1, 0, 0], sizes = [1, 8, 128], strides = [1, 1, 1]} : vector<3x8x128xf32> to vector<1x8x128xf32>
    %34 = vector.shape_cast %33 : vector<1x8x128xf32> to vector<8x128xf32>
    %35 = arith.mulf %32, %34 : vector<8x128xf32>
    %36 = arith.addf %30, %35 : vector<8x128xf32>
    %37 = vector.extract_strided_slice %6 {offsets = [2, 0, 0], sizes = [1, 8, 128], strides = [1, 1, 1]} : vector<3x8x128xf32> to vector<1x8x128xf32>
    %38 = vector.shape_cast %37 : vector<1x8x128xf32> to vector<8x128xf32>
    %39 = vector.extract_strided_slice %7 {offsets = [2, 0, 0], sizes = [1, 8, 128], strides = [1, 1, 1]} : vector<3x8x128xf32> to vector<1x8x128xf32>
    %40 = vector.shape_cast %39 : vector<1x8x128xf32> to vector<8x128xf32>
    %41 = arith.mulf %38, %40 : vector<8x128xf32>
    %42 = arith.addf %36, %41 : vector<8x128xf32>
    %43 = tpu.concatenate %0, %25 in 1 : vector<8x128xf32>, vector<8x128xf32> -> vector<8x256xf32>
    %c0_6 = arith.constant 0 : index
    %c0_7 = arith.constant 0 : index
    %44 = vector.load %arg4[%c0_6, %c0_7] : memref<256x128xf32, #tpu.memory_space<vmem>>, vector<256x128xf32>
    %cst_8 = arith.constant dense<0.000000e+00> : vector<8x128xf32>
    %45 = tpu.matmul %43, %44, %cst_8 {dimension_numbers = #tpu.dot_dimension_numbers<[1], [0], [0], [1], [0, 0, 1, 1], [], []>} : vector<8x256xf32>, vector<256x128xf32>, vector<8x128xf32> -> vector<8x128xf32>
    %c0_9 = arith.constant 0 : index
    %c0_10 = arith.constant 0 : index
    %46 = vector.load %arg5[%c0_9, %c0_10] : memref<1x128xf32, #tpu.memory_space<vmem>>, vector<1x128xf32>
    %47 = vector.broadcast %46 : vector<1x128xf32> to vector<8x128xf32>
    %48 = arith.addf %45, %47 : vector<8x128xf32>
    %49 = arith.negf %48 : vector<8x128xf32>
    %50 = math.exp %49 : vector<8x128xf32>
    %cst_11 = arith.constant 1.000000e+00 : f32
    %51 = vector.broadcast %cst_11 : f32 to vector<8x128xf32>
    %52 = arith.addf %51, %50 : vector<8x128xf32>
    %53 = arith.divf %51, %52 : vector<8x128xf32>
    %54 = arith.mulf %48, %53 : vector<8x128xf32>
    %c0_12 = arith.constant 0 : index
    %c0_13 = arith.constant 0 : index
    %55 = vector.load %arg6[%c0_12, %c0_13] : memref<128x384xf32, #tpu.memory_space<vmem>>, vector<128x384xf32>
    %cst_14 = arith.constant dense<0.000000e+00> : vector<8x384xf32>
    %56 = tpu.matmul %54, %55, %cst_14 {dimension_numbers = #tpu.dot_dimension_numbers<[1], [0], [0], [1], [0, 0, 1, 1], [], []>} : vector<8x128xf32>, vector<128x384xf32>, vector<8x384xf32> -> vector<8x384xf32>
    %c0_15 = arith.constant 0 : index
    %c0_16 = arith.constant 0 : index
    %57 = vector.load %arg7[%c0_15, %c0_16] : memref<1x384xf32, #tpu.memory_space<vmem>>, vector<1x384xf32>
    %58 = vector.broadcast %57 : vector<1x384xf32> to vector<8x384xf32>
    %59 = arith.addf %56, %58 : vector<8x384xf32>
    %60 = vector.extract_strided_slice %59 {offsets = [0, 0], sizes = [8, 128], strides = [1, 1]} : vector<8x384xf32> to vector<8x128xf32>
    %61 = vector.extract_strided_slice %59 {offsets = [0, 128], sizes = [8, 128], strides = [1, 1]} : vector<8x384xf32> to vector<8x128xf32>
    %62 = vector.extract_strided_slice %59 {offsets = [0, 256], sizes = [8, 128], strides = [1, 1]} : vector<8x384xf32> to vector<8x128xf32>
    %63 = arith.addf %0, %60 : vector<8x128xf32>
    %64 = arith.mulf %61, %42 : vector<8x128xf32>
    %65 = arith.addf %63, %64 : vector<8x128xf32>
    %c0_17 = arith.constant 0 : index
    %c0_18 = arith.constant 0 : index
    %66 = vector.load %arg8[%c0_17, %c0_18] : memref<8x128xf32, #tpu.memory_space<vmem>>, vector<8x128xf32>
    tpu.vector_store %arg8[%c0_17, %c0_18], %65 {strides = array<i32>} : memref<8x128xf32, #tpu.memory_space<vmem>>, vector<8x128xf32>,
    %67 = vector.shape_cast %62 : vector<8x128xf32> to vector<1x8x128xf32>
    %68 = vector.broadcast %67 : vector<1x8x128xf32> to vector<3x8x128xf32>
    %69 = arith.mulf %68, %6 : vector<3x8x128xf32>
    %70 = arith.addf %1, %69 : vector<3x8x128xf32>
    %c0_19 = arith.constant 0 : index
    %c0_20 = arith.constant 0 : index
    %c0_21 = arith.constant 0 : index
    %71 = vector.load %arg9[%c0_19, %c0_20, %c0_21] : memref<3x8x128xf32, #tpu.memory_space<vmem>>, vector<3x8x128xf32>
    tpu.vector_store %arg9[%c0_19, %c0_20, %c0_21], %70 {strides = array<i32>} : memref<3x8x128xf32, #tpu.memory_space<vmem>>, vector<3x8x128xf32>,
    return
  }
  func.func @transform_0(%arg0: i32) -> (i32, i32) {
    %c0_i32 = arith.constant 0 : i32
    %c0_i32_0 = arith.constant 0 : i32
    return %arg0, %c0_i32 : i32, i32
  }
  func.func @transform_1(%arg0: i32) -> (i32, i32, i32) {
    %c0_i32 = arith.constant 0 : i32
    %c0_i32_0 = arith.constant 0 : i32
    %c0_i32_1 = arith.constant 0 : i32
    return %c0_i32, %arg0, %c0_i32_0 : i32, i32, i32
  }
  func.func @transform_2(%arg0: i32) -> (i32, i32) {
    %c0_i32 = arith.constant 0 : i32
    %c0_i32_0 = arith.constant 0 : i32
    %c0_i32_1 = arith.constant 0 : i32
    return %c0_i32, %c0_i32_0 : i32, i32
  }
  func.func @transform_3(%arg0: i32) -> (i32, i32) {
    %c0_i32 = arith.constant 0 : i32
    %c0_i32_0 = arith.constant 0 : i32
    %c0_i32_1 = arith.constant 0 : i32
    return %c0_i32, %c0_i32_0 : i32, i32
  }
  func.func @transform_4(%arg0: i32) -> (i32, i32) {
    %c0_i32 = arith.constant 0 : i32
    %c0_i32_0 = arith.constant 0 : i32
    %c0_i32_1 = arith.constant 0 : i32
    return %c0_i32, %c0_i32_0 : i32, i32
  }
  func.func @transform_5(%arg0: i32) -> (i32, i32) {
    %c0_i32 = arith.constant 0 : i32
    %c0_i32_0 = arith.constant 0 : i32
    %c0_i32_1 = arith.constant 0 : i32
    return %c0_i32, %c0_i32_0 : i32, i32
  }
  func.func @transform_6(%arg0: i32) -> (i32, i32) {
    %c0_i32 = arith.constant 0 : i32
    %c0_i32_0 = arith.constant 0 : i32
    %c0_i32_1 = arith.constant 0 : i32
    return %c0_i32, %c0_i32_0 : i32, i32
  }
  func.func @transform_7(%arg0: i32) -> (i32, i32) {
    %c0_i32 = arith.constant 0 : i32
    %c0_i32_0 = arith.constant 0 : i32
    return %arg0, %c0_i32 : i32, i32
  }
  func.func @transform_8(%arg0: i32) -> (i32, i32, i32) {
    %c0_i32 = arith.constant 0 : i32
    %c0_i32_0 = arith.constant 0 : i32
    %c0_i32_1 = arith.constant 0 : i32
    return %c0_i32, %arg0, %c0_i32_0 : i32, i32, i32
  }
}

</mosaic_0001>

<bundles_post_ra>
// kernel: tpu_custom_call.1
= control target key start
LH: loop header
LB: loop body
LE: loop exit
PB: predicated region body
PF: predicated region fallthrough
CT: control target
= control target key end

     0   :  { %14 = vsyncpa [#allocation3], 0  ;;  %s806_s0 = inlined_call_operand.hbm [shape: f32[8,128], index: 0, kind: input, shape index: {}]   ;;  %s807_s1 = inlined_call_operand.hbm [shape: f32[3,8,128], index: 1, kind: input, shape index: {}]   ;;  %s808_s2 = inlined_call_operand.hbm [shape: f32[128,256], index: 2, kind: input, shape index: {}]   ;;  %s809_s3 = inlined_call_operand.hbm [shape: f32[256,128], index: 3, kind: input, shape index: {}]   ;;  %s810_s4 = inlined_call_operand.vmem [shape: f32[1,128], index: 4, kind: input, shape index: {}]   ;;  %s811_s5 = inlined_call_operand.hbm [shape: f32[128,384], index: 5, kind: input, shape index: {}]   ;;  %s812_s6 = inlined_call_operand.vmem [shape: f32[1,384], index: 6, kind: input, shape index: {}]   ;;  %s813_s7 = inlined_call_operand.hbm [shape: f32[8,128], index: 7, kind: output, shape index: {0}]   ;;  %s814_s8 = inlined_call_operand.hbm [shape: f32[3,8,128], index: 8, kind: output, shape index: {1}]  }
   0x1   :  { %15 = vsyncpa [#allocation6], 0 }
   0x2   :  { %16 = vsyncpa [#allocation9], 0 }
   0x3   :  { %17 = vsyncpa [#allocation4], 0  ;;  %s34_s29 = sshll.u32 %s807_s1, 4  ;;  %s35_s29 = int_to_ptr.hbm [resolvable:$true] %s34_s29 }
   0x4   :  { %18 = vsyncpa [#allocation13], 0  ;;  %s677_s30 = smov [#allocation5]   ;;  %s60_s12 = sshll.u32 %s809_s3, 4  ;;  %s61_s12 = int_to_ptr.hbm [resolvable:$true] %s60_s12 }
   0x5   :  { %s36_s9 = sshll.u32 %s677_s30, 4  ;;  %s678_s13 = smov 128   ;;  %s37_s9 = int_to_ptr.vmem [resolvable:$true] %s36_s9 }
   0x6   :  { %s679_s14 = smov 8   ;;  %s680_s15 = smov [#allocation8]  }
   0x7   :  { %42 = dma.hbm_to_vmem [thread:$0]  %s35_s29, 384, %s37_s9, [#allocation6], %s678_s13, %s678_s13, %s679_s14  }
   0x8   :  { %s62_s16 = sshll.u32 %s680_s15, 4  ;;  %s24_s18 = sshll.u32 %s806_s0, 4  ;;  %s63_s16 = int_to_ptr.vmem [resolvable:$true] %s62_s16  ;;  %s25_s18 = int_to_ptr.hbm [resolvable:$true] %s24_s18 }
   0x9   :  { %68 = dma.hbm_to_vmem [thread:$0]  %s61_s12, 4096, %s63_s16, [#allocation9], %s678_s13, %s678_s13, %s679_s14  }
   0xa   :  { %s47_s20 = sshll.u32 %s808_s2, 4  ;;  %s681_s21 = smov [#allocation2]   ;;  %s48_s20 = int_to_ptr.hbm [resolvable:$true] %s47_s20 }
   0xb   :  { %s26_s22 = sshll.u32 %s681_s21, 4  ;;  %s682_s23 = smov [#allocation7]   ;;  %s27_s22 = int_to_ptr.vmem [resolvable:$true] %s26_s22 }
   0xc   :  { %29 = dma.hbm_to_vmem [thread:$0]  %s25_s18, 128, %s27_s22, [#allocation3]  }
   0xd   :  { %s49_s24 = sshll.u32 %s682_s23, 4  ;;  %s683_s25 = smov 256   ;;  %s50_s24 = int_to_ptr.vmem [resolvable:$true] %s49_s24 }
   0xe   :  { %s684_s0 = smov 16   ;;  %s75_s28 = sshll.u32 %s811_s5, 4  ;;  %s76_s28 = int_to_ptr.hbm [resolvable:$true] %s75_s28 }
   0xf   :  { %55 = dma.hbm_to_vmem [thread:$0]  %s48_s20, 4096, %s50_s24, [#allocation6], %s683_s25, %s683_s25, %s684_s0  }
  0x10   :  { %s685_s29 = smov [#allocation10]   ;;  %s686_s2 = smov 384  }
  0x11   :  { %s77_s30 = sshll.u32 %s685_s29, 4  ;;  %s687_s9 = smov 24   ;;  %s78_s30 = int_to_ptr.vmem [resolvable:$true] %s77_s30 }
  0x12   :  { %83 = dma.hbm_to_vmem [thread:$0]  %s76_s28, 6144, %s78_s30, [#allocation9], %s686_s2, %s686_s2, %s687_s9  }
  0x13   :  { %667 = dma.done.wait [#allocation3], 128  }
  0x14   :  { %668 = vsyncadd [#allocation3], 4294967168 }
  0x15   :  { %669 = dma.done.wait [#allocation6], 4480  }
  0x16   :  { %670 = vsyncadd [#allocation6], 4294962816 }
  0x17   :  { %671 = dma.done.wait [#allocation9], 10240  }
  0x18   :  { %672 = vsyncadd [#allocation9], 4294957056  ;;  %v140_v0 = vld [vmem:[#allocation7 + $0xf0] sm:$0xff]  ;;  %v141_v1 = vld [vmem:[#allocation7 + $0xf8] sm:$0xff]  ;;  %s688_s12 = smov [#allocation11]   ;;  %s448_s1 = sshll.u32 %s813_s7, 4  ;;  %s449_s1 = int_to_ptr.hbm [resolvable:$true] %s448_s1 }
  0x19   :  { %v138_v2 = vld [vmem:[#allocation7 + $0xe0] sm:$0xff]  ;;  %142 = vmatpush.msra.mxu0 %v140_v0  ;;  %168 = vmatpush.msra.mxu1 %v141_v1  ;;  %v139_v3 = vld [vmem:[#allocation7 + $0xe8] sm:$0xff]  ;;  %v136_v4 = vld [vmem:[#allocation7 + $0xd0] sm:$0xff]  ;;  %s446_s15 = sshll.u32 %s688_s12, 4  ;;  %s458_s19 = sshll.u32 %s814_s8, 4  ;;  %s447_s15 = int_to_ptr.vmem [resolvable:$true] %s446_s15  ;;  %s459_s19 = int_to_ptr.hbm [resolvable:$true] %s458_s19 }
  0x1a   :  { %v137_v5 = vld [vmem:[#allocation7 + $0xd8] sm:$0xff]  ;;  %v134_v6 = vld [vmem:[#allocation7 + $0xc0] sm:$0xff]  ;;  %v135_v7 = vld [vmem:[#allocation7 + $0xc8] sm:$0xff] }
  0x1b   :  { %143 = vmatpush.msra.mxu0 %v138_v2  ;;  %169 = vmatpush.msra.mxu1 %v139_v3  ;;  %v132_v8 = vld [vmem:[#allocation7 + $0xb0] sm:$0xff]  ;;  %v133_v9 = vld [vmem:[#allocation7 + $0xb8] sm:$0xff]  ;;  %v130_v10 = vld [vmem:[#allocation7 + $0xa0] sm:$0xff] }
  0x1c   :  { %v131_v11 = vld [vmem:[#allocation7 + $0xa8] sm:$0xff]  ;;  %v128_v12 = vld [vmem:[#allocation7 + $0x90] sm:$0xff]  ;;  %v129_v13 = vld [vmem:[#allocation7 + $0x98] sm:$0xff] }
  0x1d   :  { %144 = vmatpush.msra.mxu0 %v136_v4  ;;  %170 = vmatpush.msra.mxu1 %v137_v5  ;;  %v126_v14 = vld [vmem:[#allocation7 + $0x80] sm:$0xff]  ;;  %v127_v15 = vld [vmem:[#allocation7 + $0x88] sm:$0xff]  ;;  %v124_v16 = vld [vmem:[#allocation7 + $0x70] sm:$0xff] }
  0x1e   :  { %v125_v17 = vld [vmem:[#allocation7 + $0x78] sm:$0xff]  ;;  %v122_v18 = vld [vmem:[#allocation7 + $0x60] sm:$0xff]  ;;  %v123_v19 = vld [vmem:[#allocation7 + $0x68] sm:$0xff] }
  0x1f   :  { %145 = vmatpush.msra.mxu0 %v134_v6  ;;  %171 = vmatpush.msra.mxu1 %v135_v7  ;;  %v120_v20 = vld [vmem:[#allocation7 + $0x50] sm:$0xff]  ;;  %v121_v21 = vld [vmem:[#allocation7 + $0x58] sm:$0xff]  ;;  %v118_v22 = vld [vmem:[#allocation7 + $0x40] sm:$0xff] }
  0x20   :  { %v119_v23 = vld [vmem:[#allocation7 + $0x48] sm:$0xff]  ;;  %v116_v24 = vld [vmem:[#allocation7 + $0x30] sm:$0xff]  ;;  %v117_v25 = vld [vmem:[#allocation7 + $0x38] sm:$0xff] }
  0x21   :  { %146 = vmatpush.msra.mxu0 %v132_v8  ;;  %172 = vmatpush.msra.mxu1 %v133_v9  ;;  %v114_v26 = vld [vmem:[#allocation7 + $0x20] sm:$0xff]  ;;  %v115_v27 = vld [vmem:[#allocation7 + $0x28] sm:$0xff]  ;;  %v112_v28 = vld [vmem:[#allocation7 + $0x10] sm:$0xff] }
  0x22   :  { %v113_v29 = vld [vmem:[#allocation7 + $0x18] sm:$0xff]  ;;  %v110_v30 = vld [vmem:[#allocation7] sm:$0xff]  ;;  %v111_v31 = vld [vmem:[#allocation7 + $0x8] sm:$0xff] }
  0x23   :  { %147 = vmatpush.msra.mxu0 %v130_v10  ;;  %173 = vmatpush.msra.mxu1 %v131_v11  ;;  %v756_v32 = vld [vmem:[#allocation5] sm:$0xff]  ;;  %v760_v33 = vld [vmem:[#allocation5 + $0x8] sm:$0xff]  ;;  %v764_v34 = vld [vmem:[#allocation5 + $0x10] sm:$0xff] }
  0x24   :  { %v231_v35 = vld [vmem:[#allocation8 + $0x78] sm:$0xff]  ;;  %v230_v36 = vld [vmem:[#allocation8 + $0x70] sm:$0xff]  ;;  %v229_v38 = vld [vmem:[#allocation8 + $0x68] sm:$0xff] }
  0x25   :  { %148 = vmatpush.msra.mxu0 %v128_v12  ;;  %174 = vmatpush.msra.mxu1 %v129_v13  ;;  %v247_v37 = vld [vmem:[#allocation8 + $0xf8] sm:$0xff]  ;;  %v246_v39 = vld [vmem:[#allocation8 + $0xf0] sm:$0xff]  ;;  %v228_v40 = vld [vmem:[#allocation8 + $0x60] sm:$0xff] }
  0x26   :  { %252 = vmatpush.msra.mxu2 %v231_v35  ;;  %272 = vmatpush.msra.mxu3 %v247_v37  ;;  %v245_v41 = vld [vmem:[#allocation8 + $0xe8] sm:$0xff]  ;;  %v227_v42 = vld [vmem:[#allocation8 + $0x58] sm:$0xff]  ;;  %v244_v43 = vld [vmem:[#allocation8 + $0xe0] sm:$0xff] }
  0x27   :  { %149 = vmatpush.msra.mxu0 %v126_v14  ;;  %175 = vmatpush.msra.mxu1 %v127_v15  ;;  %v226_v44 = vld [vmem:[#allocation8 + $0x50] sm:$0xff]  ;;  %v243_v45 = vld [vmem:[#allocation8 + $0xd8] sm:$0xff]  ;;  %v225_v46 = vld [vmem:[#allocation8 + $0x48] sm:$0xff] }
  0x28   :  { %253 = vmatpush.msra.mxu2 %v230_v36  ;;  %273 = vmatpush.msra.mxu3 %v246_v39  ;;  %v242_v47 = vld [vmem:[#allocation8 + $0xd0] sm:$0xff]  ;;  %v224_v48 = vld [vmem:[#allocation8 + $0x40] sm:$0xff]  ;;  %v241_v49 = vld [vmem:[#allocation8 + $0xc8] sm:$0xff] }
  0x29   :  { %150 = vmatpush.msra.mxu0 %v124_v16  ;;  %176 = vmatpush.msra.mxu1 %v125_v17  ;;  %v223_v50 = vld [vmem:[#allocation8 + $0x38] sm:$0xff]  ;;  %v240_v51 = vld [vmem:[#allocation8 + $0xc0] sm:$0xff]  ;;  %v222_v52 = vld [vmem:[#allocation8 + $0x30] sm:$0xff] }
  0x2a   :  { %254 = vmatpush.msra.mxu2 %v229_v38  ;;  %274 = vmatpush.msra.mxu3 %v245_v41  ;;  %v239_v53 = vld [vmem:[#allocation8 + $0xb8] sm:$0xff]  ;;  %v221_v54 = vld [vmem:[#allocation8 + $0x28] sm:$0xff]  ;;  %v238_v55 = vld [vmem:[#allocation8 + $0xb0] sm:$0xff] }
  0x2b   :  { %151 = vmatpush.msra.mxu0 %v122_v18  ;;  %177 = vmatpush.msra.mxu1 %v123_v19  ;;  %v220_v56 = vld [vmem:[#allocation8 + $0x20] sm:$0xff]  ;;  %v237_v57 = vld [vmem:[#allocation8 + $0xa8] sm:$0xff]  ;;  %v219_v58 = vld [vmem:[#allocation8 + $0x18] sm:$0xff] }
  0x2c   :  { %255 = vmatpush.msra.mxu2 %v228_v40  ;;  %275 = vmatpush.msra.mxu3 %v244_v43  ;;  %v236_v59 = vld [vmem:[#allocation8 + $0xa0] sm:$0xff]  ;;  %v218_v62 = vld [vmem:[#allocation8 + $0x10] sm:$0xff]  ;;  %v235_v63 = vld [vmem:[#allocation8 + $0x98] sm:$0xff] }
  0x2d   :  { %152 = vmatpush.msra.mxu0 %v120_v20  ;;  %178 = vmatpush.msra.mxu1 %v121_v21  ;;  %v217_v0 = vld [vmem:[#allocation8 + $0x8] sm:$0xff]  ;;  %v234_v1 = vld [vmem:[#allocation8 + $0x90] sm:$0xff]  ;;  %v216_v2 = vld [vmem:[#allocation8] sm:$0xff] }
  0x2e   :  { %256 = vmatpush.msra.mxu2 %v227_v42  ;;  %276 = vmatpush.msra.mxu3 %v243_v45  ;;  %v233_v3 = vld [vmem:[#allocation8 + $0x88] sm:$0xff]  ;;  %v770_v4 = vld [vmem:[#allocation2] sm:$0xff]  ;;  %v351_v36 = vld [vmem:[#allocation10 + $0x138] sm:$0xff] }
  0x2f   :  { %153 = vmatpush.msra.mxu0 %v118_v22  ;;  %179 = vmatpush.msra.mxu1 %v119_v23  ;;  %v232_v5 = vld [vmem:[#allocation8 + $0x80] sm:$0xff]  ;;  %v353_v38 = vld [vmem:[#allocation10 + $0x148] sm:$0xff]  ;;  %v350_v41 = vld [vmem:[#allocation10 + $0x130] sm:$0xff] }
  0x30   :  { %257 = vmatpush.msra.mxu2 %v226_v44  ;;  %277 = vmatpush.msra.mxu3 %v242_v47  ;;  %v356_v35 = vld [vmem:[#allocation10 + $0x160] sm:$0xff]  ;;  %v349_v40 = vld [vmem:[#allocation10 + $0x128] sm:$0xff]  ;;  %v346_v43 = vld [vmem:[#allocation10 + $0x110] sm:$0xff] }
  0x31   :  { %154 = vmatpush.msra.mxu0 %v116_v24  ;;  %180 = vmatpush.msra.mxu1 %v117_v25  ;;  %v352_v37 = vld [vmem:[#allocation10 + $0x140] sm:$0xff]  ;;  %v345_v42 = vld [vmem:[#allocation10 + $0x108] sm:$0xff]  ;;  %v347_v44 = vld [vmem:[#allocation10 + $0x118] sm:$0xff] }
  0x32   :  { %258 = vmatpush.msra.mxu2 %v225_v46  ;;  %278 = vmatpush.msra.mxu3 %v241_v49  ;;  %v348_v39 = vld [vmem:[#allocation10 + $0x120] sm:$0xff]  ;;  %v342_v45 = vld [vmem:[#allocation10 + $0xf0] sm:$0xff]  ;;  %v343_v46 = vld [vmem:[#allocation10 + $0xf8] sm:$0xff] }
  0x33   :  { %155 = vmatpush.msra.mxu0 %v114_v26  ;;  %181 = vmatpush.msra.mxu1 %v115_v27  ;;  %v357_v27 = vld [vmem:[#allocation10 + $0x168] sm:$0xff]  ;;  %v344_v47 = vld [vmem:[#allocation10 + $0x100] sm:$0xff] }
  0x34   :  { %259 = vmatpush.msra.mxu2 %v224_v48  ;;  %279 = vmatpush.msra.mxu3 %v240_v51  ;;  %v339_v48 = vld [vmem:[#allocation10 + $0xd8] sm:$0xff]  ;;  %v340_v49 = vld [vmem:[#allocation10 + $0xe0] sm:$0xff] }
  0x35   :  { %156 = vmatpush.msra.mxu0 %v112_v28  ;;  %182 = vmatpush.msra.mxu1 %v113_v29  ;;  %v358_v28 = vld [vmem:[#allocation10 + $0x170] sm:$0xff]  ;;  %v359_v29 = vld [vmem:[#allocation10 + $0x178] sm:$0xff]  ;;  %v336_v51 = vld [vmem:[#allocation10 + $0xc0] sm:$0xff] }
  0x36   :  { %260 = vmatpush.msra.mxu2 %v223_v50  ;;  %280 = vmatpush.msra.mxu3 %v239_v53  ;;  %v341_v50 = vld [vmem:[#allocation10 + $0xe8] sm:$0xff]  ;;  %v338_v53 = vld [vmem:[#allocation10 + $0xd0] sm:$0xff] }
  0x37   :  { %157 = vmatpush.msra.mxu0 %v110_v30  ;;  %183 = vmatpush.msra.mxu1 %v111_v31  ;;  %v354_v30 = vld [vmem:[#allocation10 + $0x150] sm:$0xff]  ;;  %v355_v31 = vld [vmem:[#allocation10 + $0x158] sm:$0xff] }
  0x38   :  { %158 = vmatmul.f32.vlgmr.msra.gmra.mxu0 %v756_v32  ;;  %184 = vmatmul.f32.vlgmr.msra.gmra.mxu1 %v756_v32 }
  0x39   :  { %261 = vmatpush.msra.mxu2 %v222_v52  ;;  %281 = vmatpush.msra.mxu3 %v238_v55  ;;  %v337_v52 = vld [vmem:[#allocation10 + $0xc8] sm:$0xff]  ;;  %v334_v55 = vld [vmem:[#allocation10 + $0xb0] sm:$0xff] }
  0x3a   :  { %368 = vmatpush.msrb.mxu0 %v357_v27  ;;  %388 = vmatpush.msrb.mxu1 %v358_v28 }
  0x3b   :  { %262 = vmatpush.msra.mxu2 %v221_v54  ;;  %282 = vmatpush.msra.mxu3 %v237_v57  ;;  %v333_v54 = vld [vmem:[#allocation10 + $0xa8] sm:$0xff]  ;;  %v330_v57 = vld [vmem:[#allocation10 + $0x90] sm:$0xff] }
  0x3c   :  { %369 = vmatpush.msrb.mxu0 %v354_v30  ;;  %389 = vmatpush.msrb.mxu1 %v355_v31 }
  0x3d   :  { %263 = vmatpush.msra.mxu2 %v220_v56  ;;  %283 = vmatpush.msra.mxu3 %v236_v59  ;;  %v335_v56 = vld [vmem:[#allocation10 + $0xb8] sm:$0xff]  ;;  %v332_v59 = vld [vmem:[#allocation10 + $0xa0] sm:$0xff] }
  0x3e   :  { %370 = vmatpush.msrb.mxu0 %v351_v36  ;;  %390 = vmatpush.msrb.mxu1 %v352_v37 }
  0x3f   :  { %264 = vmatpush.msra.mxu2 %v219_v58  ;;  %284 = vmatpush.msra.mxu3 %v235_v63  ;;  %v331_v58 = vld [vmem:[#allocation10 + $0x98] sm:$0xff]  ;;  %v329_v63 = vld [vmem:[#allocation10 + $0x88] sm:$0xff] }
  0x40   :  { %161 = vmatmul.f32.gmra.mxu0 %v760_v33  ;;  %187 = vmatmul.f32.gmra.mxu1 %v760_v33 }
  0x41   :  { %265 = vmatpush.msra.mxu2 %v218_v62  ;;  %285 = vmatpush.msra.mxu3 %v234_v1  ;;  %v328_v62 = vld [vmem:[#allocation10 + $0x80] sm:$0xff]  ;;  %v325_v1 = vld [vmem:[#allocation10 + $0x68] sm:$0xff] }
  0x42   :  { %371 = vmatpush.msrb.mxu0 %v348_v39  ;;  %391 = vmatpush.msrb.mxu1 %v349_v40 }
  0x43   :  { %266 = vmatpush.msra.mxu2 %v217_v0  ;;  %286 = vmatpush.msra.mxu3 %v233_v3  ;;  %v324_v0 = vld [vmem:[#allocation10 + $0x60] sm:$0xff] }
  0x44   :  { %372 = vmatpush.msrb.mxu0 %v345_v42  ;;  %392 = vmatpush.msrb.mxu1 %v346_v43  ;;  %v492_v3 = vld [vmem:[%s810_s4] ss:$0 sm:$0xff] }
  0x45   :  { %267 = vmatpush.msra.mxu2 %v216_v2  ;;  %287 = vmatpush.msra.mxu3 %v232_v5  ;;  %v326_v2 = vld [vmem:[#allocation10 + $0x70] sm:$0xff]  ;;  %v321_v5 = vld [vmem:[#allocation10 + $0x48] sm:$0xff]  ;;  %v360_v42 = vld [vmem:[%s812_s6] sm:$0x7]  ;;  %s689_s6 = smov [#allocation12]  }
  0x46   :  { %268 = vmatmul.f32.vlgmr.msra.gmra.mxu2 %v770_v4  ;;  %373 = vmatpush.msrb.mxu0 %v342_v45  ;;  %v363_v45 = vperm.slane %v360_v42, 1  ;;  %s456_s18 = sshll.u32 %s689_s6, 4  ;;  %s457_s18 = int_to_ptr.vmem [resolvable:$true] %s456_s18 }
  0x47   :  { %408 = vmatpush.msrb.mxu2 %v359_v29  ;;  %393 = vmatpush.msrb.mxu1 %v343_v46 }
  0x48   :  { %164 = vmatmul.f32.gmra.mxu0 %v764_v34  ;;  %190 = vmatmul.f32.gmra.mxu1 %v764_v34 }
  0x49   :  { %409 = vmatpush.msrb.mxu2 %v356_v35  ;;  %374 = vmatpush.msrb.mxu0 %v339_v48 }
  0x4a   :  { %394 = vmatpush.msrb.mxu1 %v340_v49 }
  0x4b   :  { %410 = vmatpush.msrb.mxu2 %v353_v38  ;;  %375 = vmatpush.msrb.mxu0 %v336_v51 }
  0x4c   :  { %395 = vmatpush.msrb.mxu1 %v337_v52 }
  0x4d   :  { %411 = vmatpush.msrb.mxu2 %v350_v41  ;;  %376 = vmatpush.msrb.mxu0 %v333_v54 }
  0x4e   :  { %396 = vmatpush.msrb.mxu1 %v334_v55 }
  0x4f   :  { %412 = vmatpush.msrb.mxu2 %v347_v44  ;;  %377 = vmatpush.msrb.mxu0 %v330_v57  ;;  %v362_v44 = vperm.slane %v360_v42, 0 }
  0x50   :  { %397 = vmatpush.msrb.mxu1 %v331_v58 }
  0x51   :  { %413 = vmatpush.msrb.mxu2 %v344_v47 }
  0x52   :  { %398 = vmatpush.msrb.mxu1 %v328_v62 }
  0x53   :  { %414 = vmatpush.msrb.mxu2 %v341_v50 }
  0x54   :  { %399 = vmatpush.msrb.mxu1 %v325_v1 }
  0x55   :  { %415 = vmatpush.msrb.mxu2 %v338_v53  ;;  %v364_v53 = vperm.slane %v360_v42, 2 }
  0x57   :  { %416 = vmatpush.msrb.mxu2 %v335_v56 }
  0x59   :  { %417 = vmatpush.msrb.mxu2 %v332_v59 }
  0x5b   :  { %418 = vmatpush.msrb.mxu2 %v329_v63 }
  0x5d   :  { %419 = vmatpush.msrb.mxu2 %v326_v2 }
  0xb5   :  { %v768_v60 = vpop.f32.mrf.mxu0  ;;  %v185_v61 = vpop.f32.mrf.mxu1 }
  0xb6   :  { %v211_v8 = vmul.f32 %v185_v61, %v768_v60  ;;  %v194_v12 = vmul.f32 %v185_v61, %v185_v61  ;;  %v327_v61 = vld [vmem:[#allocation10 + $0x78] sm:$0xff] }
  0xb7   :  { %378 = vmatpush.msrb.mxu0 %v327_v61 }
  0xb9   :  { %379 = vmatpush.msrb.mxu0 %v324_v0 }
  0xbb   :  { %380 = vmatpush.msrb.mxu0 %v321_v5 }
  0xbd   :  { %v772_v6 = vpop.f32.mrf.mxu0  ;;  %v188_v7 = vpop.f32.mrf.mxu1 }
  0xbe   :  { %v212_v9 = vmul.f32 %v188_v7, %v772_v6  ;;  %v195_v11 = vmul.f32 %v188_v7, %v188_v7  ;;  %v322_v7 = vld [vmem:[#allocation10 + $0x50] sm:$0xff] }
  0xbf   :  { %400 = vmatpush.msrb.mxu1 %v322_v7 }
  0xc0   :  { %v777_v10 = vadd.f32 %v212_v9, %v211_v8  ;;  %v196_v14 = vadd.f32 %v195_v11, %v194_v12  ;;  %v323_v8 = vld [vmem:[#allocation10 + $0x58] sm:$0xff]  ;;  %v318_v11 = vld [vmem:[#allocation10 + $0x30] sm:$0xff] }
  0xc1   :  { %420 = vmatpush.msrb.mxu2 %v323_v8  ;;  %v319_v12 = vld [vmem:[#allocation10 + $0x38] sm:$0xff]  ;;  %381 = vmatpush.msrb.mxu0 %v318_v11 }
  0xc2   :  { %401 = vmatpush.msrb.mxu1 %v319_v12 }
  0xc5   :  { %v779_v13 = vpop.f32.mrf.mxu1  ;;  %v165_v41 = vpop.f32.mrf.mxu0 }
  0xc6   :  { %v197_v15 = vmul.f32 %v779_v13, %v779_v13  ;;  %v214_v43 = vmul.f32 %v779_v13, %v165_v41 }
  0xc8   :  { %v198_v16 = vadd.f32 %v197_v15, %v196_v14  ;;  %v320_v14 = vld [vmem:[#allocation10 + $0x40] sm:$0xff]  ;;  %v215_v48 = vadd.f32 %v214_v43, %v777_v10 }
  0xc9   :  { %v269_v9 = vpop.f32.mrf.mxu2  ;;  %421 = vmatpush.msrb.mxu2 %v320_v14 }
  0xca   :  { %493 = vrsqrt.f32 %v198_v16  ;;  %vm206_vm0 = vcmp.eq.f32.partialorder %v198_v16, inf  ;;  %v209_v24 = vand.u32 2147483648, %v198_v16  ;;  %vm208_vm1 = vcmp.eq.f32.partialorder %v198_v16, 0.0 }
  0xcb   :  { %v270_v15 = vadd.f32 %v492_v3, %v269_v9 }
  0xd0   :  { %v494_v17 = vpop.eup %493 }
  0xd1   :  { %v200_v18 = vmul.f32 %v494_v17, %v198_v16 }
  0xd3   :  { %v201_v19 = vmul.f32 %v494_v17, %v200_v18  ;;  %v317_v18 = vld [vmem:[#allocation10 + $0x28] sm:$0xff] }
  0xd4   :  { %422 = vmatpush.msrb.mxu2 %v317_v18 }
  0xd5   :  { %v202_v20 = vmul.f32 0.5, %v201_v19  ;;  %v312_v19 = vld [vmem:[#allocation10] sm:$0xff] }
  0xd7   :  { %v203_v21 = vsub.f32 1.5, %v202_v20  ;;  %v313_v20 = vld [vmem:[#allocation10 + $0x8] sm:$0xff] }
  0xd9   :  { %v204_v22 = vmul.f32 %v494_v17, %v203_v21  ;;  %v316_v17 = vld [vmem:[#allocation10 + $0x20] sm:$0xff]  ;;  %v314_v21 = vld [vmem:[#allocation10 + $0x10] sm:$0xff] }
  0xda   :  { %402 = vmatpush.msrb.mxu1 %v316_v17  ;;  %423 = vmatpush.msrb.mxu2 %v314_v21 }
  0xdb   :  { %v205_v23 = vmul.f32 %v204_v22, %v198_v16 }
  0xdc   :  { %403 = vmatpush.msrb.mxu1 %v313_v20 }
  0xdd   :  { %v207_v25 = vsel %vm206_vm0, %v198_v16, %v205_v23  ;;  %v315_v16 = vld [vmem:[#allocation10 + $0x18] sm:$0xff] }
  0xde   :  { %v210_v26 = vsel %vm208_vm1, %v209_v24, %v207_v25  ;;  %382 = vmatpush.msrb.mxu0 %v315_v16 }
  0xdf   :  { %288 = vmatmul.f32.vlgmr.msra.gmra.mxu3 %v210_v26 }
  0xe0   :  { %383 = vmatpush.msrb.mxu0 %v312_v19 }
 0x162   :  { %v289_v22 = vpop.f32.mrf.mxu3 }
 0x163   :  { %v290_v23 = vadd.f32 %v289_v22, %v270_v15 }
 0x165   :  { %v478_v24 = vmul.f32 -1.442695, %v290_v23 }
 0x167   :  { %495 = vpow2.f32 %v478_v24 }
 0x16d   :  { %v496_v25 = vpop.eup %495 }
 0x16e   :  { %v295_v26 = vadd.f32 1.0, %v496_v25 }
 0x170   :  { %497 = vrcp.f32 %v295_v26  ;;  %v307_v30 = vand.u32 2147483648, %v295_v26  ;;  %v305_v35 = vand.u32 2147483647, %v295_v26  ;;  %vm301_vm3 = vweird.f32 %v295_v26 }
 0x172   :  { %v308_v37 = vor.u32 1.1754944e-38, %v307_v30  ;;  %vm306_vm5 = vcmp.eq.f32.partialorder %v305_v35, 8.507059e+37 }
 0x176   :  { %v498_v27 = vpop.eup %497 }
 0x177   :  { %v297_v28 = vmul.f32 %v498_v27, %v295_v26  ;;  %vm302_vm2 = vweird.f32 %v498_v27 }
 0x178   :  { %vm303_vm4 = vmor %vm301_vm3, %vm302_vm2 }
 0x179   :  { %v298_v29 = vsub.f32 1.0, %v297_v28 }
 0x17b   :  { %v299_v31 = vmul.f32 %v498_v27, %v298_v29 }
 0x17d   :  { %v300_v36 = vadd.f32 %v498_v27, %v299_v31 }
 0x17f   :  { %v304_v38 = vsel %vm303_vm4, %v498_v27, %v300_v36 }
 0x180   :  { %v309_v39 = vsel %vm306_vm5, %v308_v37, %v304_v38 }
 0x181   :  { %v311_v40 = vmul.f32 %v309_v39, %v290_v23 }
 0x183   :  { %384 = vmatmul.f32.vlgmr.msrb.gmra.mxu0 %v311_v40  ;;  %404 = vmatmul.f32.vlgmr.msrb.gmra.mxu1 %v311_v40 }
 0x184   :  { %424 = vmatmul.f32.vlgmr.msrb.gmra.mxu2 %v311_v40 }
 0x200   :  { %v385_v46 = vpop.f32.mrf.mxu0  ;;  %v405_v47 = vpop.f32.mrf.mxu1 }
 0x201   :  { %v386_v49 = vadd.f32 %v385_v46, %v362_v44  ;;  %v406_v50 = vadd.f32 %v405_v47, %v363_v45 }
 0x203   :  { %v428_v51 = vadd.f32 %v386_v49, %v770_v4  ;;  %v429_v52 = vmul.f32 %v406_v50, %v215_v48 }
 0x205   :  { %v430_v54 = vadd.f32 %v429_v52, %v428_v51 }
 0x207   :  { %431 = vst [vmem:[#allocation11] sm:$0xff] %v430_v54  ;;  %v425_v13 = vpop.f32.mrf.mxu2 }
 0x208   :  { %v426_v55 = vadd.f32 %v425_v13, %v364_v53  ;;  %451 = dma.vmem_to_hbm [thread:$0]  %s447_s15, 128, %s449_s1, [#allocation4]  }
 0x20a   :  { %v432_v10 = vmul.f32 %v426_v55, %v768_v60  ;;  %v433_v56 = vmul.f32 %v426_v55, %v772_v6  ;;  %v434_v57 = vmul.f32 %v426_v55, %v165_v41 }
 0x20c   :  { %v435_v4 = vadd.f32 %v432_v10, %v756_v32  ;;  %v436_v58 = vadd.f32 %v433_v56, %v760_v33  ;;  %v437_v59 = vadd.f32 %v434_v57, %v764_v34 }
 0x20e   :  { %438 = vst [vmem:[#allocation12] sm:$0xff] %v435_v4 }
 0x20f   :  { %439 = vst [vmem:[#allocation12 + $0x8] sm:$0xff] %v436_v58 }
 0x210   :  { %440 = vst [vmem:[#allocation12 + $0x10] sm:$0xff] %v437_v59 }
 0x211   :  { %464 = dma.vmem_to_hbm [thread:$0]  %s457_s18, 384, %s459_s19, [#allocation13], %s678_s13, %s678_s13, %s679_s14  }
 0x212   :  { %673 = dma.done.wait [#allocation4], 128  }
 0x213   :  { %674 = vsyncadd [#allocation4], 4294967168 }
 0x214   :  { %675 = dma.done.wait [#allocation13], 384  }
 0x215   :  { %676 = vsyncadd [#allocation13], 4294966912 }
 0x216   :  { %473 = vsyncpa [#allocation3], 1 }
 0x217   :  { %474 = vsyncpa [#allocation6], 1 }
 0x218   :  { %475 = vsyncpa [#allocation9], 1 }
 0x219   :  { %476 = vsyncpa [#allocation4], 1 }
 0x21a   :  { %477 = vsyncpa [#allocation13], 1 }

</bundles_post_ra>
